<compile_context>
chip_gen: v7x
topology: tpu7x:2x2x1
jax: 0.10.0
libtpu: 0.0.40
codegen_flags: <defaults>
</compile_context>

<pallas_src>
import jax
import jax.numpy as jnp
from jax import lax
from jax.experimental import pallas as pl
from jax.experimental.pallas import tpu as pltpu

block_size = 64
n_emb = 256
head_size = 32
dropout_n = 0.35  # unused (eval mode)


def head_kernel(x_ref, wq_ref, wk_ref, wv_ref, o_ref):
    Bb, T, C = x_ref.shape
    H = o_ref.shape[-1]

    # (Bb, T, C) -> (Bb*T, C): merges leading dims only; layout-preserving for
    # T % 8 == 0, so the projections see one fat M = Bb*T MXU matmul each.
    x2d = x_ref[...].reshape(Bb * T, C)

    # QKV projections (f32 operands, f32 accumulation).
    q = jnp.dot(x2d, wq_ref[...],
                preferred_element_type=jnp.float32).reshape(Bb, T, H)
    k = jnp.dot(x2d, wk_ref[...],
                preferred_element_type=jnp.float32).reshape(Bb, T, H)
    v = jnp.dot(x2d, wv_ref[...],
                preferred_element_type=jnp.float32).reshape(Bb, T, H)

    # Attention scores.  NOTE: no 1/sqrt(H) scaling -- intentionally matches the
    # reference PyTorch module; do NOT reuse this as standard scaled attention.
    # bf16 operands / f32 accumulation; contracting on H folds the k transpose.
    wei = lax.dot_general(
        q.astype(jnp.bfloat16), k.astype(jnp.bfloat16),
        dimension_numbers=(((2,), (2,)), ((0,), (0,))),
        preferred_element_type=jnp.float32)            # (Bb, T, T)

    # Causal mask == tril[:T, :T], built once per grid step.
    row = lax.broadcasted_iota(jnp.int32, (T, T), 0)
    col = lax.broadcasted_iota(jnp.int32, (T, T), 1)
    wei = jnp.where((col <= row)[None, :, :], wei, -1e30)  # Python literal: no
                                                           # captured constant.

    # Numerically stable softmax along the last axis.
    wei = wei - jnp.max(wei, axis=-1, keepdims=True)
    e = jnp.exp(wei)
    p = e * pl.reciprocal(jnp.sum(e, axis=-1, keepdims=True), approx=False)

    # Dropout: identity (eval mode).

    # out = p @ v, batched over Bb; bf16 operands / f32 accumulation.
    out = lax.dot_general(
        p.astype(jnp.bfloat16), v.astype(jnp.bfloat16),
        dimension_numbers=(((2,), (1,)), ((0,), (0,))),
        preferred_element_type=jnp.float32)
    o_ref[...] = out.astype(o_ref.dtype)


def _pick_batch_block(B, T, C, vmem_budget_bytes=16 << 20):
    """Largest divisor of B whose per-step working set fits a ~16 MiB budget.

    - If the whole batch fits, return B (grid = 1): best on single-TC v5e/v6e,
      where extra grid steps are pure overhead.
    - For large B this caps the block so per-core VMEM stays well under the
      32 MiB scoped default (64 MiB physical on v7x) and the grid naturally has
      >= 2 "parallel" steps for v7x's two TensorCores.
    """
    # Rough f32 bytes per batch row: x block (double-buffered), q/k/v
    # (lane-padded to 128), scores, out block (double-buffered, lane-padded).
    per_b = 4 * (2 * T * C + 3 * T * 128 + T * max(T, 128) + 2 * T * 128)
    cap = max(1, min(64, vmem_budget_bytes // per_b))
    if B <= cap:
        return B
    for bb in range(cap, 0, -1):
        if B % bb == 0:
            return bb
    return 1


def head_forward(x, wq, wk, wv):
    B, T, C = x.shape
    H = wq.shape[1]
    Bb = _pick_batch_block(B, T, C)

    cost = pl.CostEstimate(
        flops=2 * B * T * C * (3 * H) + 4 * B * T * T * H,
        transcendentals=B * T * T + B * T,
        bytes_accessed=4 * (B * T * C + 3 * C * H + B * T * H),
    )
    return pl.pallas_call(
        head_kernel,
        out_shape=jax.ShapeDtypeStruct((B, T, H), jnp.float32),
        grid_spec=pl.GridSpec(
            grid=(B // Bb,),
            in_specs=[
                pl.BlockSpec((Bb, T, C), lambda b: (b, 0, 0)),
                pl.BlockSpec((C, H), lambda b: (0, 0)),  # weights VMEM-resident
                pl.BlockSpec((C, H), lambda b: (0, 0)),
                pl.BlockSpec((C, H), lambda b: (0, 0)),
            ],
            out_specs=pl.BlockSpec((Bb, T, H), lambda b: (b, 0, 0)),
        ),
        compiler_params=pltpu.CompilerParams(
            dimension_semantics=("parallel",)),
        cost_estimate=cost,
    )(x, wq, wk, wv)


def head_reference(x, wq, wk, wv):
    """Pure-JAX reference matching the PyTorch forward (eval mode, f32)."""
    k = x @ wk
    q = x @ wq
    v = x @ wv
    wei = jnp.einsum("btd,bsd->bts", q, k)
    T = x.shape[1]
    tril = jnp.tril(jnp.ones((T, T), dtype=bool))
    wei = jnp.where(tril, wei, -jnp.inf)
    wei = jax.nn.softmax(wei, axis=-1)
    return wei @ v


if __name__ == "__main__":
    key = jax.random.PRNGKey(0)
    kx, kk, kq, kv = jax.random.split(key, 4)

    B, T = 2, 8          # T <= block_size
    x = jax.random.normal(kx, (B, T, n_emb), dtype=jnp.float32)

    # Deterministic params: nn.Linear(n_emb, head_size, bias=False) init,
    # stored pre-transposed as (n_emb, head_size).
    scale = 1.0 / float(n_emb) ** 0.5
    wk = jax.random.uniform(kk, (n_emb, head_size), jnp.float32, -scale, scale)
    wq = jax.random.uniform(kq, (n_emb, head_size), jnp.float32, -scale, scale)
    wv = jax.random.uniform(kv, (n_emb, head_size), jnp.float32, -scale, scale)

    out = head_forward(x, wq, wk, wv)
    out = jax.block_until_ready(out)

    ref = head_reference(x, wq, wk, wv)
    assert out.shape == (B, T, head_size)
    # Tolerance sized for bf16 MXU operands on the attention matmuls
    # (f32 accumulation): observed error is ~1e-3-level relative.
    assert jnp.allclose(out, ref, atol=1e-2, rtol=1e-2), "mismatch vs reference"

    print("KERNEL_OK")
</pallas_src>

<mosaic_0001>
module attributes {stable_mosaic.version = 11 : i64} {
  func.func @head_kernel(%arg0: i32, %arg1: memref<2x8x256xf32, #tpu.memory_space<vmem>>, %arg2: memref<256x32xf32, #tpu.memory_space<vmem>>, %arg3: memref<256x32xf32, #tpu.memory_space<vmem>>, %arg4: memref<256x32xf32, #tpu.memory_space<vmem>>, %arg5: memref<2x8x32xf32, #tpu.memory_space<vmem>>) attributes {dimension_semantics = [#tpu.dimension_semantics<parallel>], iteration_bounds = array<i64: 1>, scalar_prefetch = 0 : i64, scratch_operands = 0 : i64, tpu.core_type = #tpu.core_type<tc>, window_params = [{transform_indices = @transform_0, window_bounds = array<i64: 2, 8, 256>}, {pipeline_mode = #tpu.pipeline_mode<synchronous>, transform_indices = @transform_1, window_bounds = array<i64: 256, 32>}, {pipeline_mode = #tpu.pipeline_mode<synchronous>, transform_indices = @transform_2, window_bounds = array<i64: 256, 32>}, {pipeline_mode = #tpu.pipeline_mode<synchronous>, transform_indices = @transform_3, window_bounds = array<i64: 256, 32>}, {transform_indices = @transform_4, window_bounds = array<i64: 2, 8, 32>}]} {
    %c0 = arith.constant 0 : index
    %c0_0 = arith.constant 0 : index
    %c0_1 = arith.constant 0 : index
    %0 = vector.load %arg1[%c0, %c0_0, %c0_1] : memref<2x8x256xf32, #tpu.memory_space<vmem>>, vector<2x8x256xf32>
    %1 = vector.shape_cast %0 : vector<2x8x256xf32> to vector<16x256xf32>
    %c0_2 = arith.constant 0 : index
    %c0_3 = arith.constant 0 : index
    %2 = vector.load %arg2[%c0_2, %c0_3] : memref<256x32xf32, #tpu.memory_space<vmem>>, vector<256x32xf32>
    %cst = arith.constant dense<0.000000e+00> : vector<16x32xf32>
    %3 = tpu.matmul %1, %2, %cst {dimension_numbers = #tpu.dot_dimension_numbers<[1], [0], [0], [1], [0, 0, 1, 1], [], []>} : vector<16x256xf32>, vector<256x32xf32>, vector<16x32xf32> -> vector<16x32xf32>
    %4 = vector.shape_cast %3 : vector<16x32xf32> to vector<2x8x32xf32>
    %c0_4 = arith.constant 0 : index
    %c0_5 = arith.constant 0 : index
    %5 = vector.load %arg3[%c0_4, %c0_5] : memref<256x32xf32, #tpu.memory_space<vmem>>, vector<256x32xf32>
    %cst_6 = arith.constant dense<0.000000e+00> : vector<16x32xf32>
    %6 = tpu.matmul %1, %5, %cst_6 {dimension_numbers = #tpu.dot_dimension_numbers<[1], [0], [0], [1], [0, 0, 1, 1], [], []>} : vector<16x256xf32>, vector<256x32xf32>, vector<16x32xf32> -> vector<16x32xf32>
    %7 = vector.shape_cast %6 : vector<16x32xf32> to vector<2x8x32xf32>
    %c0_7 = arith.constant 0 : index
    %c0_8 = arith.constant 0 : index
    %8 = vector.load %arg4[%c0_7, %c0_8] : memref<256x32xf32, #tpu.memory_space<vmem>>, vector<256x32xf32>
    %cst_9 = arith.constant dense<0.000000e+00> : vector<16x32xf32>
    %9 = tpu.matmul %1, %8, %cst_9 {dimension_numbers = #tpu.dot_dimension_numbers<[1], [0], [0], [1], [0, 0, 1, 1], [], []>} : vector<16x256xf32>, vector<256x32xf32>, vector<16x32xf32> -> vector<16x32xf32>
    %10 = vector.shape_cast %9 : vector<16x32xf32> to vector<2x8x32xf32>
    %11 = arith.truncf %4 : vector<2x8x32xf32> to vector<2x8x32xbf16>
    %12 = arith.truncf %7 : vector<2x8x32xf32> to vector<2x8x32xbf16>
    %cst_10 = arith.constant dense<0.000000e+00> : vector<2x8x8xf32>
    %13 = tpu.matmul %11, %12, %cst_10 {dimension_numbers = #tpu.dot_dimension_numbers<[2], [2], [1], [1], [0, 0, 0, 1, 1, 1], [0], [0]>} : vector<2x8x32xbf16>, vector<2x8x32xbf16>, vector<2x8x8xf32> -> vector<2x8x8xf32>
    %14 = tpu.iota {dimensions = array<i32: 0>} : vector<8x8xi32>
    %15 = tpu.iota {dimensions = array<i32: 1>} : vector<8x8xi32>
    %16 = arith.cmpi sle, %15, %14 : vector<8x8xi32>
    %17 = vector.shape_cast %16 : vector<8x8xi1> to vector<1x8x8xi1>
    %cst_11 = arith.constant -1.000000e+30 : f32
    %18 = vector.shape_cast %17 : vector<1x8x8xi1> to vector<1x8x8xi1>
    %19 = vector.broadcast %18 : vector<1x8x8xi1> to vector<2x8x8xi1>
    %20 = vector.broadcast %cst_11 : f32 to vector<2x8x8xf32>
    %21 = arith.select %19, %13, %20 : vector<2x8x8xi1>, vector<2x8x8xf32>
    %cst_12 = arith.constant dense<0xFF800000> : vector<2x8xf32>
    %22 = vector.multi_reduction <maximumf>, %21, %cst_12 [2] : vector<2x8x8xf32> to vector<2x8xf32>
    %23 = vector.shape_cast %22 : vector<2x8xf32> to vector<2x8x1xf32>
    %24 = vector.broadcast %23 : vector<2x8x1xf32> to vector<2x8x8xf32>
    %25 = arith.subf %21, %24 : vector<2x8x8xf32>
    %26 = math.exp %25 : vector<2x8x8xf32>
    %cst_13 = arith.constant dense<0.000000e+00> : vector<2x8xf32>
    %27 = vector.multi_reduction <add>, %26, %cst_13 [2] : vector<2x8x8xf32> to vector<2x8xf32>
    %28 = vector.shape_cast %27 : vector<2x8xf32> to vector<2x8x1xf32>
    %29 = tpu.reciprocal %28 : vector<2x8x1xf32> -> vector<2x8x1xf32>
    %30 = vector.broadcast %29 : vector<2x8x1xf32> to vector<2x8x8xf32>
    %31 = arith.mulf %26, %30 : vector<2x8x8xf32>
    %32 = arith.truncf %31 : vector<2x8x8xf32> to vector<2x8x8xbf16>
    %33 = arith.truncf %10 : vector<2x8x32xf32> to vector<2x8x32xbf16>
    %cst_14 = arith.constant dense<0.000000e+00> : vector<2x8x32xf32>
    %34 = tpu.matmul %32, %33, %cst_14 {dimension_numbers = #tpu.dot_dimension_numbers<[2], [1], [1], [2], [0, 0, 0, 1, 1, 2], [0], [0]>} : vector<2x8x8xbf16>, vector<2x8x32xbf16>, vector<2x8x32xf32> -> vector<2x8x32xf32>
    %c0_15 = arith.constant 0 : index
    %c0_16 = arith.constant 0 : index
    %c0_17 = arith.constant 0 : index
    %35 = vector.load %arg5[%c0_15, %c0_16, %c0_17] : memref<2x8x32xf32, #tpu.memory_space<vmem>>, vector<2x8x32xf32>
    tpu.vector_store %arg5[%c0_15, %c0_16, %c0_17], %34 {strides = array<i32>} : memref<2x8x32xf32, #tpu.memory_space<vmem>>, vector<2x8x32xf32>,
    return
  }
  func.func @transform_0(%arg0: i32) -> (i32, i32, i32) {
    %c0_i32 = arith.constant 0 : i32
    %c0_i32_0 = arith.constant 0 : i32
    %c0_i32_1 = arith.constant 0 : i32
    return %arg0, %c0_i32, %c0_i32_0 : i32, i32, i32
  }
  func.func @transform_1(%arg0: i32) -> (i32, i32) {
    %c0_i32 = arith.constant 0 : i32
    %c0_i32_0 = arith.constant 0 : i32
    %c0_i32_1 = arith.constant 0 : i32
    return %c0_i32, %c0_i32_0 : i32, i32
  }
  func.func @transform_2(%arg0: i32) -> (i32, i32) {
    %c0_i32 = arith.constant 0 : i32
    %c0_i32_0 = arith.constant 0 : i32
    %c0_i32_1 = arith.constant 0 : i32
    return %c0_i32, %c0_i32_0 : i32, i32
  }
  func.func @transform_3(%arg0: i32) -> (i32, i32) {
    %c0_i32 = arith.constant 0 : i32
    %c0_i32_0 = arith.constant 0 : i32
    %c0_i32_1 = arith.constant 0 : i32
    return %c0_i32, %c0_i32_0 : i32, i32
  }
  func.func @transform_4(%arg0: i32) -> (i32, i32, i32) {
    %c0_i32 = arith.constant 0 : i32
    %c0_i32_0 = arith.constant 0 : i32
    %c0_i32_1 = arith.constant 0 : i32
    return %arg0, %c0_i32, %c0_i32_0 : i32, i32, i32
  }
}

</mosaic_0001>

<bundles_post_ra>
// kernel: tpu_custom_call.1
= control target key start
LH: loop header
LB: loop body
LE: loop exit
PB: predicated region body
PF: predicated region fallthrough
CT: control target
= control target key end

     0   :  { %s1252_s0 = inlined_call_operand.vmem [shape: f32[2,8,256], index: 0, kind: input, shape index: {}]   ;;  %s1253_s1 = inlined_call_operand.vmem [shape: f32[256,32], index: 1, kind: input, shape index: {}]   ;;  %s1254_s2 = inlined_call_operand.vmem [shape: f32[256,32], index: 2, kind: input, shape index: {}]   ;;  %s1255_s3 = inlined_call_operand.vmem [shape: f32[256,32], index: 3, kind: input, shape index: {}]   ;;  %s1256_s4 = inlined_call_operand.hbm [shape: f32[2,8,32], index: 4, kind: output, shape index: {}]  }
   0x1   :  { %v146_v0 = vld [vmem:[%s1254_s2 + $0x80] sm:$0xff]  ;;  %v147_v1 = vld [vmem:[%s1254_s2 + $0x88] sm:$0xff]  ;;  %v148_v5 = vld [vmem:[%s1254_s2 + $0x90] sm:$0xff] }
   0x2   :  { %v130_v2 = vld [vmem:[%s1254_s2] sm:$0xff]  ;;  %v770_v3 = vpack.c.bf16 %v147_v1, %v146_v0  ;;  %v131_v4 = vld [vmem:[%s1254_s2 + $0x8] sm:$0xff]  ;;  %v149_v6 = vld [vmem:[%s1254_s2 + $0x98] sm:$0xff] }
   0x3   :  { %v772_v7 = vpack.c.bf16 %v131_v4, %v130_v2  ;;  %v774_v8 = vpack.c.bf16 %v149_v6, %v148_v5  ;;  %v132_v9 = vld [vmem:[%s1254_s2 + $0x10] sm:$0xff]  ;;  %v133_v10 = vld [vmem:[%s1254_s2 + $0x18] sm:$0xff]  ;;  %v39_v11 = vld [vmem:[%s1253_s1 + $0x80] sm:$0xff] }
   0x4   :  { %771 = vmatprep.subr.bf16.mxu1 %v770_v3  ;;  %v40_v12 = vld [vmem:[%s1253_s1 + $0x88] sm:$0xff]  ;;  %v150_v13 = vld [vmem:[%s1254_s2 + $0xa0] sm:$0xff]  ;;  %v776_v15 = vpack.c.bf16 %v133_v10, %v132_v9  ;;  %v41_v23 = vld [vmem:[%s1253_s1 + $0x90] sm:$0xff] }
   0x5   :  { %v151_v14 = vld [vmem:[%s1254_s2 + $0xa8] sm:$0xff]  ;;  %773 = vmatpush3.bf16.msra.mxu1 %v772_v7  ;;  %v738_v16 = vpack.c.bf16 %v40_v12, %v39_v11  ;;  %v23_v17 = vld [vmem:[%s1253_s1] sm:$0xff]  ;;  %v42_v24 = vld [vmem:[%s1253_s1 + $0x98] sm:$0xff] }
   0x6   :  { %v24_v18 = vld [vmem:[%s1253_s1 + $0x8] sm:$0xff]  ;;  %v134_v19 = vld [vmem:[%s1254_s2 + $0x20] sm:$0xff]  ;;  %775 = vmatprep.subr.bf16.mxu1 %v774_v8  ;;  %v778_v20 = vpack.c.bf16 %v151_v14, %v150_v13  ;;  %v742_v25 = vpack.c.bf16 %v42_v24, %v41_v23  ;;  %v152_v26 = vld [vmem:[%s1254_s2 + $0xb0] sm:$0xff] }
   0x7   :  { %v740_v21 = vpack.c.bf16 %v24_v18, %v23_v17  ;;  %v135_v22 = vld [vmem:[%s1254_s2 + $0x28] sm:$0xff]  ;;  %739 = vmatprep.subr.bf16.mxu0 %v738_v16  ;;  %v153_v27 = vld [vmem:[%s1254_s2 + $0xb8] sm:$0xff]  ;;  %v25_v28 = vld [vmem:[%s1253_s1 + $0x10] sm:$0xff] }
   0x8   :  { %v26_v29 = vld [vmem:[%s1253_s1 + $0x18] sm:$0xff]  ;;  %v780_v30 = vpack.c.bf16 %v135_v22, %v134_v19  ;;  %v136_v32 = vld [vmem:[%s1254_s2 + $0x30] sm:$0xff]  ;;  %v43_v33 = vld [vmem:[%s1253_s1 + $0xa0] sm:$0xff]  ;;  %v782_v35 = vpack.c.bf16 %v153_v27, %v152_v26 }
   0x9   :  { %741 = vmatpush3.bf16.msra.mxu0 %v740_v21  ;;  %777 = vmatpush3.bf16.msra.mxu1 %v776_v15  ;;  %v744_v31 = vpack.c.bf16 %v26_v29, %v25_v28  ;;  %v44_v34 = vld [vmem:[%s1253_s1 + $0xa8] sm:$0xff]  ;;  %v137_v36 = vld [vmem:[%s1254_s2 + $0x38] sm:$0xff]  ;;  %v27_v38 = vld [vmem:[%s1253_s1 + $0x20] sm:$0xff] }
   0xa   :  { %743 = vmatprep.subr.bf16.mxu0 %v742_v25  ;;  %779 = vmatprep.subr.bf16.mxu1 %v778_v20  ;;  %v746_v37 = vpack.c.bf16 %v44_v34, %v43_v33  ;;  %v28_v39 = vld [vmem:[%s1253_s1 + $0x28] sm:$0xff]  ;;  %v154_v40 = vld [vmem:[%s1254_s2 + $0xc0] sm:$0xff]  ;;  %v45_v42 = vld [vmem:[%s1253_s1 + $0xb0] sm:$0xff]  ;;  %v784_v45 = vpack.c.bf16 %v137_v36, %v136_v32 }
   0xb   :  { %v155_v41 = vld [vmem:[%s1254_s2 + $0xc8] sm:$0xff]  ;;  %v748_v43 = vpack.c.bf16 %v28_v39, %v27_v38  ;;  %v46_v44 = vld [vmem:[%s1253_s1 + $0xb8] sm:$0xff]  ;;  %v138_v46 = vld [vmem:[%s1254_s2 + $0x40] sm:$0xff] }
   0xc   :  { %v750_v47 = vpack.c.bf16 %v46_v44, %v45_v42  ;;  %v29_v48 = vld [vmem:[%s1253_s1 + $0x30] sm:$0xff]  ;;  %v30_v49 = vld [vmem:[%s1253_s1 + $0x38] sm:$0xff]  ;;  %v786_v50 = vpack.c.bf16 %v155_v41, %v154_v40  ;;  %v139_v51 = vld [vmem:[%s1254_s2 + $0x48] sm:$0xff] }
   0xd   :  { %745 = vmatpush3.bf16.msra.mxu0 %v744_v31  ;;  %781 = vmatpush3.bf16.msra.mxu1 %v780_v30  ;;  %v47_v52 = vld [vmem:[%s1253_s1 + $0xc0] sm:$0xff]  ;;  %v48_v53 = vld [vmem:[%s1253_s1 + $0xc8] sm:$0xff]  ;;  %v156_v54 = vld [vmem:[%s1254_s2 + $0xd0] sm:$0xff]  ;;  %v752_v56 = vpack.c.bf16 %v30_v49, %v29_v48  ;;  %v788_v57 = vpack.c.bf16 %v139_v51, %v138_v46 }
   0xe   :  { %747 = vmatprep.subr.bf16.mxu0 %v746_v37  ;;  %783 = vmatprep.subr.bf16.mxu1 %v782_v35  ;;  %v157_v55 = vld [vmem:[%s1254_s2 + $0xd8] sm:$0xff]  ;;  %v140_v58 = vld [vmem:[%s1254_s2 + $0x50] sm:$0xff]  ;;  %v754_v59 = vpack.c.bf16 %v48_v53, %v47_v52  ;;  %v31_v60 = vld [vmem:[%s1253_s1 + $0x40] sm:$0xff] }
   0xf   :  { %v32_v61 = vld [vmem:[%s1253_s1 + $0x48] sm:$0xff]  ;;  %v790_v62 = vpack.c.bf16 %v157_v55, %v156_v54  ;;  %v141_v63 = vld [vmem:[%s1254_s2 + $0x58] sm:$0xff]  ;;  %v49_v0 = vld [vmem:[%s1253_s1 + $0xd0] sm:$0xff] }
  0x10   :  { %v50_v1 = vld [vmem:[%s1253_s1 + $0xd8] sm:$0xff]  ;;  %v158_v2 = vld [vmem:[%s1254_s2 + $0xe0] sm:$0xff]  ;;  %v159_v3 = vld [vmem:[%s1254_s2 + $0xe8] sm:$0xff]  ;;  %v756_v5 = vpack.c.bf16 %v32_v61, %v31_v60  ;;  %v792_v6 = vpack.c.bf16 %v141_v63, %v140_v58 }
  0x11   :  { %749 = vmatpush3.bf16.msra.mxu0 %v748_v43  ;;  %785 = vmatpush3.bf16.msra.mxu1 %v784_v45  ;;  %v20_v4 = vld [vmem:[%s1252_s0 + $0x8] sm:$0xff]  ;;  %v142_v7 = vld [vmem:[%s1254_s2 + $0x60] sm:$0xff]  ;;  %v758_v8 = vpack.c.bf16 %v50_v1, %v49_v0  ;;  %v33_v9 = vld [vmem:[%s1253_s1 + $0x50] sm:$0xff]  ;;  %v794_v11 = vpack.c.bf16 %v159_v3, %v158_v2 }
  0x12   :  { %751 = vmatprep.subr.bf16.mxu0 %v750_v47  ;;  %787 = vmatprep.subr.bf16.mxu1 %v786_v50  ;;  %v34_v10 = vld [vmem:[%s1253_s1 + $0x58] sm:$0xff]  ;;  %v143_v12 = vld [vmem:[%s1254_s2 + $0x68] sm:$0xff]  ;;  %v51_v13 = vld [vmem:[%s1253_s1 + $0xe0] sm:$0xff] }
  0x13   :  { %226 = vmatprep.mubr.f32.mxu1 %v20_v4  ;;  %v52_v14 = vld [vmem:[%s1253_s1 + $0xe8] sm:$0xff]  ;;  %119 = vmatprep.mubr.f32.mxu0 %v20_v4  ;;  %v160_v15 = vld [vmem:[%s1254_s2 + $0xf0] sm:$0xff]  ;;  %v161_v16 = vld [vmem:[%s1254_s2 + $0xf8] sm:$0xff] }
  0x15   :  { %753 = vmatpush3.bf16.msra.mxu0 %v752_v56  ;;  %789 = vmatpush3.bf16.msra.mxu1 %v788_v57 }
  0x16   :  { %755 = vmatprep.subr.bf16.mxu0 %v754_v59  ;;  %791 = vmatprep.subr.bf16.mxu1 %v790_v62 }
  0x17   :  { %9 = vsyncpa [#allocation3], 0  ;;  %v760_v17 = vpack.c.bf16 %v34_v10, %v33_v9  ;;  %v796_v18 = vpack.c.bf16 %v143_v12, %v142_v7  ;;  %v144_v19 = vld [vmem:[%s1254_s2 + $0x70] sm:$0xff]  ;;  %v762_v20 = vpack.c.bf16 %v52_v14, %v51_v13  ;;  %v35_v21 = vld [vmem:[%s1253_s1 + $0x60] sm:$0xff]  ;;  %v798_v23 = vpack.c.bf16 %v161_v16, %v160_v15 }
  0x18   :  { %v36_v22 = vld [vmem:[%s1253_s1 + $0x68] sm:$0xff]  ;;  %v145_v24 = vld [vmem:[%s1254_s2 + $0x78] sm:$0xff]  ;;  %v53_v25 = vld [vmem:[%s1253_s1 + $0xf0] sm:$0xff]  ;;  %v871_v36 = vmov 0.0   ;;  %vm872_vm0 = vmmov 0   ;;  %vm348_vm1 = vcmask 261120  }
  0x19   :  { %757 = vmatpush3.bf16.msra.mxu0 %v756_v5  ;;  %793 = vmatpush3.bf16.msra.mxu1 %v792_v6  ;;  %v54_v26 = vld [vmem:[%s1253_s1 + $0xf8] sm:$0xff]  ;;  %v764_v27 = vpack.c.bf16 %v36_v22, %v35_v21  ;;  %v800_v28 = vpack.c.bf16 %v145_v24, %v144_v19  ;;  %v37_v30 = vld [vmem:[%s1253_s1 + $0x70] sm:$0xff]  ;;  %v1099_v33 = vld [vmem:[%s1252_s0] sm:$0xff]  ;;  %vm450_vm3 = vcmask 64512   ;;  %vm480_vm4 = vcmask 1043456  }
  0x1a   :  { %759 = vmatprep.subr.bf16.mxu0 %v758_v8  ;;  %795 = vmatprep.subr.bf16.mxu1 %v794_v11  ;;  %v766_v29 = vpack.c.bf16 %v54_v26, %v53_v25  ;;  %v38_v31 = vld [vmem:[%s1253_s1 + $0x78] sm:$0xff]  ;;  %v1111_v35 = vld [vmem:[%s1252_s0 + $0x10] sm:$0xff]  ;;  %v253_v55 = vld [vmem:[%s1255_s3 + $0x80] sm:$0xff] }
  0x1b   :  { %v768_v32 = vpack.c.bf16 %v38_v31, %v37_v30  ;;  %v1104_v34 = vld [vmem:[%s1252_s0 + $0x18] sm:$0xff]  ;;  %v254_v56 = vld [vmem:[%s1255_s3 + $0x88] sm:$0xff]  ;;  %v237_v57 = vld [vmem:[%s1255_s3] sm:$0xff] }
  0x1c   :  { %v802_v58 = vpack.c.bf16 %v254_v56, %v253_v55  ;;  %v238_v59 = vld [vmem:[%s1255_s3 + $0x8] sm:$0xff]  ;;  %v255_v60 = vld [vmem:[%s1255_s3 + $0x90] sm:$0xff]  ;;  %v256_v61 = vld [vmem:[%s1255_s3 + $0x98] sm:$0xff] }
  0x1d   :  { %761 = vmatpush3.bf16.msra.mxu0 %v760_v17  ;;  %797 = vmatpush3.bf16.msra.mxu1 %v796_v18  ;;  %v804_v62 = vpack.c.bf16 %v238_v59, %v237_v57  ;;  %v806_v63 = vpack.c.bf16 %v256_v61, %v255_v60  ;;  %v239_v0 = vld [vmem:[%s1255_s3 + $0x10] sm:$0xff]  ;;  %v240_v1 = vld [vmem:[%s1255_s3 + $0x18] sm:$0xff]  ;;  %v257_v2 = vld [vmem:[%s1255_s3 + $0xa0] sm:$0xff] }
  0x1e   :  { %763 = vmatprep.subr.bf16.mxu0 %v762_v20  ;;  %799 = vmatprep.subr.bf16.mxu1 %v798_v23  ;;  %v258_v3 = vld [vmem:[%s1255_s3 + $0xa8] sm:$0xff]  ;;  %v241_v6 = vld [vmem:[%s1255_s3 + $0x20] sm:$0xff]  ;;  %v259_v8 = vld [vmem:[%s1255_s3 + $0xb0] sm:$0xff] }
  0x1f   :  { %v810_v5 = vpack.c.bf16 %v258_v3, %v257_v2  ;;  %v242_v7 = vld [vmem:[%s1255_s3 + $0x28] sm:$0xff]  ;;  %v260_v9 = vld [vmem:[%s1255_s3 + $0xb8] sm:$0xff]  ;;  %v243_v12 = vld [vmem:[%s1255_s3 + $0x30] sm:$0xff] }
  0x20   :  { %v812_v10 = vpack.c.bf16 %v242_v7, %v241_v6  ;;  %v814_v11 = vpack.c.bf16 %v260_v9, %v259_v8  ;;  %v244_v13 = vld [vmem:[%s1255_s3 + $0x38] sm:$0xff]  ;;  %v261_v14 = vld [vmem:[%s1255_s3 + $0xc0] sm:$0xff]  ;;  %v262_v15 = vld [vmem:[%s1255_s3 + $0xc8] sm:$0xff] }
  0x21   :  { %765 = vmatpush3.bf16.msra.mxu0 %v764_v27  ;;  %801 = vmatpush3.bf16.msra.mxu1 %v800_v28  ;;  %v816_v16 = vpack.c.bf16 %v244_v13, %v243_v12  ;;  %v818_v17 = vpack.c.bf16 %v262_v15, %v261_v14  ;;  %v245_v18 = vld [vmem:[%s1255_s3 + $0x40] sm:$0xff]  ;;  %v246_v19 = vld [vmem:[%s1255_s3 + $0x48] sm:$0xff]  ;;  %v263_v20 = vld [vmem:[%s1255_s3 + $0xd0] sm:$0xff] }
  0x22   :  { %767 = vmatprep.subr.bf16.mxu0 %v766_v29  ;;  %714 = vmatprep.subr.bf16.mxu1 %v871_v36  ;;  %v264_v21 = vld [vmem:[%s1255_s3 + $0xd8] sm:$0xff]  ;;  %v820_v22 = vpack.c.bf16 %v246_v19, %v245_v18  ;;  %v247_v24 = vld [vmem:[%s1255_s3 + $0x50] sm:$0xff]  ;;  %v265_v26 = vld [vmem:[%s1255_s3 + $0xe0] sm:$0xff] }
  0x23   :  { %v822_v23 = vpack.c.bf16 %v264_v21, %v263_v20  ;;  %v248_v25 = vld [vmem:[%s1255_s3 + $0x58] sm:$0xff]  ;;  %v266_v27 = vld [vmem:[%s1255_s3 + $0xe8] sm:$0xff]  ;;  %v249_v30 = vld [vmem:[%s1255_s3 + $0x60] sm:$0xff] }
  0x24   :  { %227 = vmatmul.mubr.f32.vlgmr.msra.gmra.mrb[0].mxu1 %v1099_v33  ;;  %v824_v28 = vpack.c.bf16 %v248_v25, %v247_v24  ;;  %v826_v29 = vpack.c.bf16 %v266_v27, %v265_v26  ;;  %v250_v31 = vld [vmem:[%s1255_s3 + $0x68] sm:$0xff] }
  0x25   :  { %769 = vmatpush3.bf16.msra.mxu0 %v768_v32  ;;  %231 = vmatprep.mubr.f32.mxu1 %v1104_v34  ;;  %v267_v32 = vld [vmem:[%s1255_s3 + $0xf0] sm:$0xff] }
  0x26   :  { %803 = vmatprep.subr.bf16.mxu0 %v802_v58 }
  0x28   :  { %120 = vmatmul.mubr.f32.vlgmr.msra.gmra.mrb[0].mxu0 %v1099_v33  ;;  %232 = vmatmul.mubr.f32.gmra.mrb[2].mxu1 %v1111_v35 }
  0x29   :  { %124 = vmatprep.mubr.f32.mxu0 %v1104_v34  ;;  %716 = vmatprep.mubr.msk.bf16.mxu1 %vm872_vm0, %v871_v36 }
  0x2a   :  { %805 = vmatpush3.bf16.msra.mxu0 %v804_v62 }
  0x2b   :  { %807 = vmatprep.subr.bf16.mxu0 %v806_v63 }
  0x2c   :  { %125 = vmatmul.mubr.f32.gmra.mrb[2].mxu0 %v1111_v35 }
  0x2d   :  { %333 = vmatprep.mubr.f32.mxu0 %v20_v4  ;;  %v808_v4 = vpack.c.bf16 %v240_v1, %v239_v0 }
  0x2f   :  { %809 = vmatpush3.bf16.msra.mxu0 %v808_v4 }
  0x30   :  { %811 = vmatprep.subr.bf16.mxu0 %v810_v5 }
  0x33   :  { %813 = vmatpush3.bf16.msra.mxu0 %v812_v10 }
  0x34   :  { %815 = vmatprep.subr.bf16.mxu0 %v814_v11 }
  0x37   :  { %817 = vmatpush3.bf16.msra.mxu0 %v816_v16 }
  0x38   :  { %819 = vmatprep.subr.bf16.mxu0 %v818_v17 }
  0x3b   :  { %821 = vmatpush3.bf16.msra.mxu0 %v820_v22 }
  0x3c   :  { %823 = vmatprep.subr.bf16.mxu0 %v822_v23 }
  0x3f   :  { %825 = vmatpush3.bf16.msra.mxu0 %v824_v28 }
  0x40   :  { %827 = vmatprep.subr.bf16.mxu0 %v826_v29 }
  0xf7   :  { %v662_v37 = vpop.f32.mrb[0].mxu1 }
  0xf8   :  { %v663_v38 = vpop.f32.mrb[1].mxu1 }
  0xf9   :  { %v664_v39 = vadd.f32 %v663_v38, %v662_v37  ;;  %v268_v37 = vld [vmem:[%s1255_s3 + $0xf8] sm:$0xff]  ;;  %v828_v38 = vpack.c.bf16 %v250_v31, %v249_v30 }
  0xfb   :  { %v624_v40 = vpop.f32.mrb[0].mxu0  ;;  %v346_v41 = vpack.c.bf16 %v664_v39, %v664_v39  ;;  %v665_v42 = vpop.f32.mrb[2].mxu1  ;;  %v830_v39 = vpack.c.bf16 %v268_v37, %v267_v32  ;;  %829 = vmatpush3.bf16.msra.mxu0 %v828_v38 }
  0xfc   :  { %v625_v43 = vpop.f32.mrb[1].mxu0  ;;  %v666_v44 = vpop.f32.mrb[3].mxu1 }
  0xfd   :  { %v626_v45 = vadd.f32 %v625_v43, %v624_v40  ;;  %v353_v46 = vsel %vm348_vm1, %v346_v41, 0  ;;  %v667_v47 = vadd.f32 %v666_v44, %v665_v42  ;;  %v251_v40 = vld [vmem:[%s1255_s3 + $0x70] sm:$0xff]  ;;  %v252_v41 = vld [vmem:[%s1255_s3 + $0x78] sm:$0xff]  ;;  %831 = vmatprep.subr.bf16.mxu0 %v830_v39  ;;  %v441_v43 = vlaneseq  ;;  %s873_s3 = smov [#allocation2]  }
  0xfe   :  { %715 = vmatpush3.bf16.xpose.msra.mxu1 %v353_v46  ;;  %v832_v42 = vpack.c.bf16 %v252_v41, %v251_v40  ;;  %s577_s24 = sshll.u32 %s873_s3, 4  ;;  %s578_s24 = int_to_ptr.vmem [resolvable:$true] %s577_s24 }
  0xff   :  { %v627_v48 = vpop.f32.mrb[2].mxu0  ;;  %v347_v49 = vpack.c.bf16 %v667_v47, %v667_v47  ;;  %720 = vmatprep.subr.bf16.mxu1 %v871_v36  ;;  %v344_v52 = vpack.c.bf16 %v626_v45, %v626_v45  ;;  %v442_v44 = vshrl.u32 %v441_v43, 7  ;;  %v444_v45 = vand.u32 127, %v441_v43  ;;  %s847_s25 = scalar_lea.vmem %s578_s24, 256  ;;  %p852_p1 = scmp.lt.s32.totalorder %s578_s24, %s578_s24 }
 0x100   :  { %v628_v50 = vpop.f32.mrb[3].mxu0  ;;  %833 = vmatpush3.bf16.msra.mxu0 %v832_v42  ;;  %p848_p0 = scmp.ne.s32.totalorder %s578_s24, %s847_s25  ;;  %p853_p2 = scmp.lt.s32.totalorder %s847_s25, %s847_s25 }
 0x101   :  { %v629_v51 = vadd.f32 %v628_v50, %v627_v48  ;;  %v399_v53 = vsel %vm348_vm1, %v347_v49, 0  ;;  %vm445_vm2 = vcmp.le.s32.totalorder %v444_v45, %v442_v44 }
 0x102   :  { %p854_p3 = por %p853_p2, %p852_p1 }
 0x103   :  { %v345_v54 = vpack.c.bf16 %v629_v51, %v629_v51  ;;  %334 = vmatmul.mubr.f32.vlgmr.msra.gmra.mrb[4].mxu0 %v1099_v33 }
 0x104   :  { %338 = vmatprep.mubr.f32.mxu0 %v1104_v34  ;;  %p855_p4 = pnand %p854_p3, %p848_p0 }
 0x105   :  { %717 = vmatmul.mubr.msk.bf16.vlgmr.msra.gmra.mrb[4].mxu1 %vm348_vm1, %v344_v52 }
 0x106   :  { %721 = vmatpush3.bf16.xpose.msra.mxu1 %v399_v53  ;;  %722 = vmatprep.mubr.msk.bf16.mxu1 %vm872_vm0, %v871_v36 }
 0x107   :  { %726 = vmatprep.subr.bf16.mxu1 %v871_v36  ;;  %339 = vmatmul.mubr.f32.gmra.mrb[6].mxu0 %v1111_v35 }
 0x10d   :  { %723 = vmatmul.mubr.msk.bf16.vlgmr.msra.gmra.mrb[8].mxu1 %vm348_vm1, %v345_v54 }
 0x10e   :  { %728 = vmatprep.mubr.msk.bf16.mxu1 %vm872_vm0, %v871_v36 }
 0x1d6   :  { %v700_v1 = vpop.f32.mrb[4].mxu0 }
 0x1d7   :  { %v701_v2 = vpop.f32.mrb[5].mxu0 }
 0x1d8   :  { %v389_v46 = vpop.f32.mrb[4].mxu1  ;;  %v702_v3 = vadd.f32 %v701_v2, %v700_v1 }
 0x1d9   :  { %v448_v47 = vsel %vm445_vm2, %v389_v46, -1e+30  ;;  %v718_v48 = vpop.f32.mrb[5].mxu1 }
 0x1da   :  { %v392_v49 = vpop.f32.mrb[6].mxu1  ;;  %v451_v50 = vsel %vm450_vm3, %v448_v47, -inf  ;;  %v475_v4 = vpack.c.bf16 %v702_v3, %v702_v3  ;;  %v703_v6 = vpop.f32.mrb[6].mxu0 }
 0x1db   :  { %452 = vmax.xlane.f32.xlu0 %v451_v50  ;;  %v719_v51 = vpop.f32.mrb[7].mxu1  ;;  %v704_v7 = vpop.f32.mrb[7].mxu0 }
 0x1dc   :  { %v482_v5 = vsel %vm480_vm4, %v475_v4, 0  ;;  %v705_v8 = vadd.f32 %v704_v7, %v703_v6 }
 0x1dd   :  { %727 = vmatpush3.bf16.msra.mxu1 %v482_v5 }
 0x1de   :  { %732 = vmatprep.subr.bf16.mxu1 %v871_v36  ;;  %v476_v9 = vpack.c.bf16 %v705_v8, %v705_v8 }
 0x1e0   :  { %v435_v52 = vpop.f32.mrb[8].mxu1  ;;  %v528_v10 = vsel %vm480_vm4, %v476_v9, 0 }
 0x1e1   :  { %v449_v53 = vsel %vm445_vm2, %v435_v52, -1e+30  ;;  %v724_v33 = vpop.f32.mrb[9].mxu1 }
 0x1e2   :  { %v438_v54 = vpop.f32.mrb[10].mxu1  ;;  %v454_v34 = vsel %vm450_vm3, %v449_v53, -inf }
 0x1e3   :  { %455 = vmax.xlane.f32.xlu0 %v454_v34  ;;  %v725_v35 = vpop.f32.mrb[11].mxu1 }
 0x268   :  { %v453_v55 = vpop.xlane.xlu0 %452 }
 0x269   :  { %v457_v56 = vsub.f32 %v448_v47, %v453_v55 }
 0x26b   :  { %v459_v57 = vmul.f32 1.442695, %v457_v56 }
 0x26d   :  { %839 = vpow2.f32 %v459_v57 }
 0x270   :  { %v456_v58 = vpop.xlane.xlu0 %455 }
 0x271   :  { %v458_v59 = vsub.f32 %v449_v53, %v456_v58 }
 0x273   :  { %v461_v60 = vmul.f32 1.442695, %v458_v59 }
 0x275   :  { %841 = vpow2.f32 %v461_v60 }
 0x277   :  { %v840_v61 = vpop.eup %839 }
 0x278   :  { %v463_v62 = vsel %vm450_vm3, %v840_v61, 0.0 }
 0x279   :  { %464 = vadd.xlane.f32.xlu1 %v463_v62 }
 0x27f   :  { %v842_v63 = vpop.eup %841 }
 0x280   :  { %v466_v0 = vsel %vm450_vm3, %v842_v63, 0.0 }
 0x281   :  { %467 = vadd.xlane.f32.xlu1 %v466_v0 }
 0x306   :  { %v465_v11 = vpop.xlane.xlu1 %464 }
 0x307   :  { %843 = vrcp.f32 %v465_v11 }
 0x30e   :  { %v468_v12 = vpop.xlane.xlu1 %467 }
 0x30f   :  { %845 = vrcp.f32 %v468_v12 }
 0x311   :  { %v844_v13 = vpop.eup %843 }
 0x312   :  { %v471_v14 = vmul.f32 %v844_v13, %v840_v61 }
 0x314   :  { %v473_v15 = vpack.c.bf16 %v471_v14, %v471_v14 }
 0x316   :  { %729 = vmatmul.mubr.msk.bf16.vlgmr.msra.gmra.mrb[12].mxu1 %vm450_vm3, %v473_v15 }
 0x317   :  { %733 = vmatpush3.bf16.msra.mxu1 %v528_v10  ;;  %734 = vmatprep.mubr.msk.bf16.mxu1 %vm872_vm0, %v871_v36 }
 0x319   :  { %v846_v16 = vpop.eup %845 }
 0x31a   :  { %v472_v17 = vmul.f32 %v846_v16, %v842_v63 }
 0x31c   :  { %v474_v18 = vpack.c.bf16 %v472_v17, %v472_v17 }
 0x31e   :  { %735 = vmatmul.mubr.msk.bf16.vlgmr.msra.gmra.mrb[16].mxu1 %vm450_vm3, %v474_v18 }
 0x3e9   :  { %v518_v19 = vpop.f32.mrb[12].mxu1 }
 0x3ea   :  { %570 = vst.msk [vmem:[#allocation2] sm:$0xff] %vm348_vm1, %v518_v19  ;;  %v730_v20 = vpop.f32.mrb[13].mxu1 }
 0x3eb   :  { %v521_v21 = vpop.f32.mrb[14].mxu1 }
 0x3ec   :  { %v731_v22 = vpop.f32.mrb[15].mxu1 }
 0x3f1   :  { %v564_v23 = vpop.f32.mrb[16].mxu1 }
 0x3f2   :  { %571 = vst.msk [vmem:[#allocation2 + $0x8] sm:$0xff] %vm348_vm1, %v564_v23  ;;  %v736_v24 = vpop.f32.mrb[17].mxu1 }
 0x3f3   :  { %v567_v25 = vpop.f32.mrb[18].mxu1 }
 0x3f4   :  { %858 = shalt.err (!%p855_p4)
}
 0x3f5   :  { %s859_s28 = scalar_lea.hbm %s1256_s4, 256 }
 0x3f6   :  { %p860_p5 = scmp.ne.s32.totalorder %s1256_s4, %s859_s28  ;;  %p863_p6 = scmp.lt.u32.totalorder %s859_s28, %s1256_s4 }
 0x3f8   :  { %p865_p7 = pnand %p863_p6, %p860_p5 }
 0x3fa   :  { %868 = shalt.err (!%p865_p7)
}
 0x3fb   :  { %s874_s7 = smov 128   ;;  %s875_s8 = smov 8   ;;  %v737_v36 = vpop.f32.mrb[19].mxu1 }
 0x3fc   :  { %583 = dma.vmem_to_hbm [thread:$0]  %s578_s24, 256, %s1256_s4, [#allocation3], %s874_s7, %s874_s7, %s875_s8  }
 0x3fd   :  { %869 = dma.done.wait [#allocation3], 256  }
 0x3fe   :  { %870 = vsyncadd [#allocation3], 4294967040 }
 0x3ff   :  { %587 = vsyncpa [#allocation3], 1 }

</bundles_post_ra>
